<compile_context>
chip_gen: v5e
topology: v5e:2x2
jax: 0.10.0
libtpu: 0.0.40
codegen_flags: <defaults>
</compile_context>

<pallas_src>
import math

import jax
import jax.numpy as jnp
from jax.experimental import pallas as pl
from jax.experimental.pallas import tpu as pltpu

# ----------------------------- configuration --------------------------------
VBATCH = 1              # stacking semantics of the reference assume Vbatch == 1
N_CAM = 2
H = W = 16
NX = NY = NZ = 8
N_QUERY = 64            # cfg.ct_net.n_query
F_LAT = 16              # backbone latent_size
N_LAYERS_XYZ, APPEND_XYZ, HID_XYZ = 3, (1,), 32
N_LAYERS_DIR, APPEND_DIR, HID_DIR = 2, (1,), 32
DEC_HIDDEN, DEC_OUT, DEC_LAYERS = 64, 1, 3
DEC_IN = (F_LAT + HID_XYZ + HID_DIR) * N_CAM   # decoder_input_size *= n_cam
DEC_CAT_K = N_CAM * F_LAT + HID_XYZ            # merged layer-0 contraction dim
DEC_PAD = 128           # decoder output padded to a full vreg lane width
MAX_TILE_M = 1024       # row tile for the fused point/decoder kernel


# ----------------------------- shared math -----------------------------------
def _dot(a, w):
    """K<=8 contractions as VPU FMAs (f32); larger K on the MXU (bf16 in,
    f32 accumulate).  MXU weights are pre-cast to bf16 in the wrapper, so the
    astype below is a no-op for them."""
    if w.shape[0] <= 8:
        return sum(a[:, k:k + 1] * w[k:k + 1, :] for k in range(w.shape[0]))
    return jnp.dot(a.astype(jnp.bfloat16), w.astype(jnp.bfloat16),
                   preferred_element_type=jnp.float32)


def _mlp_apply(y, z, params, n_layers, skips, relu_last):
    """MLPWithInputSkips: y_{i+1} = relu(y_i @ Wy [+ z @ Wz] + b).

    Skip layers realise torch's cat([y, z], -1) @ W via split matmuls
    (identical math)."""
    skips = set(skips)
    p = 0
    for i in range(n_layers):
        h = _dot(y, params[p]); p += 1
        if i in skips:
            h = h + _dot(z, params[p]); p += 1
        h = h + params[p]; p += 1
        if (i < n_layers - 1) or relu_last:
            h = jnp.maximum(h, 0.0)
        y = h
    return y


def _point_decoder_math(qp, lat_bf16, b0_rows, xyz_prm, dec_prm):
    """Plain-JAX reference of the fused kernel math: mlp_xyz + merged
    (latent ++ qp_emb) layer-0 matmul (camera term pre-folded into b0_rows)
    + remaining decoder layers."""
    w0_cat, w1, b1, w2p, b2p = dec_prm
    qp_emb = _mlp_apply(qp, qp, xyz_prm, N_LAYERS_XYZ, APPEND_XYZ, True)
    h_in = jnp.concatenate([lat_bf16, qp_emb.astype(jnp.bfloat16)], axis=-1)
    h = jnp.dot(h_in, w0_cat, preferred_element_type=jnp.float32) + b0_rows
    h = jnp.maximum(h, 0.0).astype(jnp.bfloat16)
    h = jnp.dot(h, w1, preferred_element_type=jnp.float32) + b1
    h = jnp.maximum(h, 0.0).astype(jnp.bfloat16)
    return jnp.dot(h, w2p, preferred_element_type=jnp.float32) + b2p


# ----------------------------- Pallas kernels --------------------------------
def conv3x3_relu_kernel(p_ref, w_ref, b_ref, o_ref):
    """3x3 conv (Cin=1) in im2col form, fused ReLU, all camera images in one
    step.  Output is channels-first (Bn, Cout, H*W): last dim 256 -> lane-dense
    unmasked stores.  Nine VPU FMAs; no tiny-K MXU contraction."""
    patches = p_ref[...]                  # (Bn, 9, H*W)
    wk = w_ref[...]                       # (9, Cout, 1)
    acc = jnp.zeros(o_ref.shape, jnp.float32)
    for k in range(9):
        acc = acc + wk[k][None] * patches[:, k:k + 1, :]   # (1,Cout,1)*(Bn,1,HW)
    acc = acc + b_ref[...][None]
    o_ref[...] = jnp.maximum(acc, 0.0)


def conv3x3_relu_pallas(patches, w3d, b2d):
    bn, _, hw = patches.shape
    cout = w3d.shape[1]
    # Single step, whole arrays resident in VMEM (~50 KB total): avoids a
    # serial 2-step grid on 1-TC chips and duplicate weight DMAs.
    return pl.pallas_call(
        conv3x3_relu_kernel,
        out_shape=jax.ShapeDtypeStruct((bn, cout, hw), jnp.float32),
    )(patches, w3d, b2d)


def conv3x3_relu_ref(patches, w3d, b2d):
    acc = jnp.zeros((patches.shape[0], w3d.shape[1], patches.shape[2]),
                    jnp.float32)
    for k in range(9):
        acc = acc + w3d[k][None] * patches[:, k:k + 1, :]
    return jnp.maximum(acc + b2d[None], 0.0)


def make_point_decoder_kernel(n_xyz_params):
    def kernel(*refs):
        qp_ref, lat_ref, b0_ref = refs[:3]
        o_ref, cat_ref = refs[-2], refs[-1]          # output, bf16 VMEM scratch
        prm = refs[3:-2]
        xyz_prm = [r[...] for r in prm[:n_xyz_params]]
        w0_cat, w1, b1, w2p, b2p = [r[...] for r in prm[n_xyz_params:]]

        # mlp_xyz: K=3 layers on the VPU, K=32 layers on the MXU (f32 out).
        qp = qp_ref[...]
        qp_emb = _mlp_apply(qp, qp, xyz_prm, N_LAYERS_XYZ, APPEND_XYZ, True)

        # Pack lat (lanes 0..31) and qp_emb (lanes 32..63) into one bf16 slab
        # so layer 0 is a single K=64 MXU matmul.
        nlat = lat_ref.shape[1]
        cat_ref[:, :nlat] = lat_ref[...]
        cat_ref[:, nlat:] = qp_emb.astype(jnp.bfloat16)

        # Layer 0: camera contribution is pre-folded into the row-wise bias.
        h = jnp.dot(cat_ref[...], w0_cat,
                    preferred_element_type=jnp.float32) + b0_ref[...]
        h = jnp.maximum(h, 0.0).astype(jnp.bfloat16)
        h = jnp.dot(h, w1, preferred_element_type=jnp.float32) + b1
        h = jnp.maximum(h, 0.0).astype(jnp.bfloat16)
        o_ref[...] = jnp.dot(h, w2p, preferred_element_type=jnp.float32) + b2p
    return kernel


def _choose_tile_m(m):
    """Pick a row tile: at least 2 'parallel' tiles for small m (so both v7x
    TensorCores get work), capped at MAX_TILE_M for large m."""
    if m <= 16:
        return m
    if m <= MAX_TILE_M:
        t = ((-(-m // 2) + 7) // 8) * 8          # cdiv(m, 2) rounded up to 8
        return min(t, m)
    return MAX_TILE_M


def point_decoder_pallas(qp, lat, b0_rows, xyz_params, dec_params):
    m = qp.shape[0]
    tile_m = _choose_tile_m(m)
    prm = list(xyz_params) + list(dec_params)          # all 2-D arrays
    in_specs = [
        pl.BlockSpec((tile_m, qp.shape[1]), lambda i: (i, 0)),
        pl.BlockSpec((tile_m, lat.shape[1]), lambda i: (i, 0)),
        pl.BlockSpec((tile_m, b0_rows.shape[1]), lambda i: (i, 0)),
    ] + [pl.BlockSpec(p.shape, lambda i: (0, 0)) for p in prm]
    return pl.pallas_call(
        make_point_decoder_kernel(len(xyz_params)),
        out_shape=jax.ShapeDtypeStruct((m, DEC_PAD), jnp.float32),
        grid=(pl.cdiv(m, tile_m),),
        in_specs=in_specs,
        out_specs=pl.BlockSpec((tile_m, DEC_PAD), lambda i: (i, 0)),
        scratch_shapes=[pltpu.VMEM((tile_m, DEC_CAT_K), jnp.bfloat16)],
        compiler_params=pltpu.CompilerParams(dimension_semantics=("parallel",)),
    )(qp, lat, b0_rows, *prm)


# ----------------------------- JAX glue --------------------------------------
def bilinear_sample_cf(feat_cf, uv):
    """feat_cf: (F, H, W) channels-first; uv: (P, 2) pixel coords (u->W, v->H)."""
    _, hh, ww = feat_cf.shape
    u = jnp.clip(uv[:, 0], 0.0, ww - 1.0)
    v = jnp.clip(uv[:, 1], 0.0, hh - 1.0)
    u0 = jnp.floor(u).astype(jnp.int32)
    v0 = jnp.floor(v).astype(jnp.int32)
    u1 = jnp.minimum(u0 + 1, ww - 1)
    v1 = jnp.minimum(v0 + 1, hh - 1)
    du = u - u0
    dv = v - v0
    f00 = feat_cf[:, v0, u0]
    f01 = feat_cf[:, v0, u1]
    f10 = feat_cf[:, v1, u0]
    f11 = feat_cf[:, v1, u1]
    out = (f00 * (1 - du) * (1 - dv) + f01 * du * (1 - dv)
           + f10 * (1 - du) * dv + f11 * du * dv)        # (F, P)
    return out.T                                          # (P, F)


def project_points_synthetic(points, n_cam, h, w):
    # TODO(synk): stand-in for cameras.project_points_shdom (true camera geometry unavailable).
    cams = jnp.arange(n_cam, dtype=jnp.float32)[:, None]
    px = points[None, :, 0]
    py = points[None, :, 1]
    pz = points[None, :, 2]
    u = (0.08 + 0.8 * px + 0.06 * (cams + 1.0) * pz) * (w - 1)
    v = (0.08 + 0.8 * py + 0.04 * (cams + 1.0) * (1.0 - pz)) * (h - 1)
    return jnp.stack([u, v], axis=-1)                    # (n_cam, P, 2)


def make_mlp_params(key, in_dim, out_dims, skips, skip_dim):
    params = []
    d_prev = in_dim
    for i, d_out in enumerate(out_dims):
        fan_in = d_prev + (skip_dim if i in skips else 0)
        lim = 1.0 / math.sqrt(fan_in)
        if i in skips:
            key, k1, k2, k3 = jax.random.split(key, 4)
            params.append(jax.random.uniform(k1, (d_prev, d_out), jnp.float32, -lim, lim))
            params.append(jax.random.uniform(k2, (skip_dim, d_out), jnp.float32, -lim, lim))
            params.append(jax.random.uniform(k3, (1, d_out), jnp.float32, -lim, lim))
        else:
            key, k1, k2 = jax.random.split(key, 3)
            params.append(jax.random.uniform(k1, (d_prev, d_out), jnp.float32, -lim, lim))
            params.append(jax.random.uniform(k2, (1, d_out), jnp.float32, -lim, lim))
        d_prev = d_out
    return params


def init_params(key):
    k_enc, k_xyz, k_dir, k_dec = jax.random.split(key, 4)
    lim = 1.0 / math.sqrt(9.0)          # conv fan_in = 3*3*1
    ke1, ke2 = jax.random.split(k_enc)
    return {
        "enc_w": jax.random.uniform(ke1, (9, F_LAT), jnp.float32, -lim, lim),
        "enc_b": jax.random.uniform(ke2, (1, F_LAT), jnp.float32, -lim, lim),
        "xyz": make_mlp_params(k_xyz, 3, [HID_XYZ] * N_LAYERS_XYZ, APPEND_XYZ, 3),
        "dir": make_mlp_params(k_dir, 3, [HID_DIR] * N_LAYERS_DIR, APPEND_DIR, 3),
        "dec": make_mlp_params(k_dec, DEC_IN, [DEC_HIDDEN, DEC_HIDDEN, DEC_OUT], (), 0),
    }


def split_decoder_params(dec_params, n_cam):
    """Split the first decoder weight by row blocks so the per-point concat
    (latent ++ qp_emb ++ cam_emb) becomes split matmuls (identical math).
    NOTE: w0_qp = sum over cameras is valid only because qp_emb is identical
    for every camera in the original concat."""
    per = F_LAT + HID_XYZ + HID_DIR
    w0, b0, w1, b1, w2, b2 = dec_params
    w0_lat = jnp.concatenate(
        [w0[c * per: c * per + F_LAT] for c in range(n_cam)], axis=0)
    w0_qp = sum(w0[c * per + F_LAT: c * per + F_LAT + HID_XYZ]
                for c in range(n_cam))
    w0_cam = jnp.concatenate(
        [w0[c * per + F_LAT + HID_XYZ: (c + 1) * per] for c in range(n_cam)], axis=0)
    w0_cat = jnp.concatenate([w0_lat, w0_qp], axis=0)      # merged K=64 layer-0 weight
    w2p = jnp.pad(w2, ((0, 0), (0, DEC_PAD - DEC_OUT)))    # lane-dense final store
    b2p = jnp.pad(b2, ((0, 0), (0, DEC_PAD - DEC_OUT)))
    return w0_cat, w0_cam, b0, w1, b1, w2p, b2p


def nemf_forward(params, image, volume, masks, cam_centers, use_pallas=True):
    """Training-branch forward of NeMFnet (self.training == True)."""
    vbatch, n_cam, h, w = image.shape
    hw = h * w

    # --- backbone: 3x3 conv pad=1 + ReLU (im2col form, channels-first out) ---
    img = image.reshape(vbatch * n_cam, h, w)        # image[:, :, None] -> C==1 squeezed
    img_pad = jnp.pad(img, ((0, 0), (1, 1), (1, 1)))
    patches = jnp.stack(
        [img_pad[:, ky:ky + h, kx:kx + w].reshape(vbatch * n_cam, hw)
         for ky in range(3) for kx in range(3)], axis=1)           # (Bn, 9, H*W)
    w3d = params["enc_w"][:, :, None]                              # (9, F, 1)
    b2d = params["enc_b"].reshape(-1, 1)                           # (F, 1)
    conv_fn = conv3x3_relu_pallas if use_pallas else conv3x3_relu_ref
    feats = conv_fn(patches, w3d, b2d)                             # (Bn, F, H*W)
    feats_cf = feats.reshape(vbatch, n_cam, F_LAT, h, w)           # (V, cam, F, H, W)

    # --- volume.get_query_points_microphysics (deterministic masked selection) ---
    # TODO(synk): true Volumes query-point sampling ('random'/'topk') replaced by
    # deterministic raster-order selection of masked voxels.
    vol_flat = volume.reshape(vbatch, -1)
    mask_flat = masks.reshape(vbatch, -1)
    query_points, vol_gt = [], []
    for b in range(vbatch):
        order = jnp.argsort(jnp.where(mask_flat[b], 0, 1))
        idx = order[:N_QUERY]
        iz = idx % NZ
        iy = (idx // NZ) % NY
        ix = idx // (NY * NZ)
        pts = jnp.stack([(ix + 0.5) / NX, (iy + 0.5) / NY, (iz + 0.5) / NZ],
                        axis=-1).astype(jnp.float32)
        query_points.append(pts)
        vol_gt.append(vol_flat[b][idx])
    n_query = [p.shape[0] for p in query_points]

    # --- camera projection (uv, screen coords) ---
    uv = [project_points_synthetic(p, n_cam, h, w) for p in query_points]

    # --- mlp_cam_center: tiny (n_cam, 3) MLP, plain JAX; its output is folded
    #     into the decoder layer-0 bias below (constant per batch element) ---
    cc = cam_centers.reshape(-1, 3)
    embed_cam = _mlp_apply(cc, cc, params["dir"], N_LAYERS_DIR, APPEND_DIR, True)
    embed_cam = embed_cam.reshape(vbatch, n_cam * HID_DIR)

    # --- decoder weights: split for the merged concat, fold camera term into
    #     the bias, pre-cast MXU weights to bf16 once in the wrapper ---
    w0_cat, w0_cam, b0, w1, b1, w2p, b2p = split_decoder_params(params["dec"], n_cam)
    b0_eff = embed_cam @ w0_cam + b0                               # (vbatch, 64) f32
    dec_prm = (w0_cat.astype(jnp.bfloat16), w1.astype(jnp.bfloat16), b1,
               w2p.astype(jnp.bfloat16), b2p)
    xyz_prm = [p.astype(jnp.bfloat16) if p.shape[0] > 8 else p
               for p in params["xyz"]]                             # K<=8 stays f32 (VPU)

    # --- sample_roi (bilinear, data-dependent gather -> JAX glue), then stack
    #     all batches into ONE fused decoder call (matches torch.vstack) ---
    # TODO(synk): bilinear ROI sampling has no clean BlockSpec form; kept in JAX.
    lat_list = []
    for b in range(vbatch):
        lat_b = jax.vmap(bilinear_sample_cf)(feats_cf[b], uv[b])   # (cam, P, F)
        lat_b = jnp.swapaxes(lat_b, 0, 1).reshape(n_query[b], n_cam * F_LAT)
        lat_list.append(lat_b)
    qp_all = jnp.concatenate(query_points, axis=0)                 # (M, 3)
    lat_all = jnp.concatenate(lat_list, axis=0).astype(jnp.bfloat16)   # (M, 32)
    b0_rows = jnp.concatenate(
        [jnp.broadcast_to(b0_eff[b:b + 1], (n_query[b], b0_eff.shape[1]))
         for b in range(vbatch)], axis=0)                          # (M, 64)

    if use_pallas:
        out_all = point_decoder_pallas(qp_all, lat_all, b0_rows, xyz_prm, dec_prm)
    else:
        out_all = _point_decoder_math(qp_all, lat_all, b0_rows, xyz_prm, dec_prm)

    outs, off = [], 0
    for b in range(vbatch):
        outs.append(out_all[off:off + n_query[b], :DEC_OUT])       # (P, 1)
        off += n_query[b]
    return {"output": outs, "volume": vol_gt}


# ----------------------------- entry point -----------------------------------
if __name__ == "__main__":
    import numpy as np

    key = jax.random.PRNGKey(0)
    kp, ki, kv, kc = jax.random.split(key, 4)

    params = init_params(kp)
    image = jax.random.uniform(ki, (VBATCH, N_CAM, H, W), jnp.float32)
    volume = jax.random.uniform(kv, (VBATCH, NX, NY, NZ), jnp.float32)
    masks = volume > 0.2
    cam_centers = (jax.random.uniform(kc, (VBATCH, N_CAM, 3), jnp.float32) - 0.5) * 4.0

    out = nemf_forward(params, image, volume, masks, cam_centers, use_pallas=True)
    jax.block_until_ready(out["output"][0])

    ref = nemf_forward(params, image, volume, masks, cam_centers, use_pallas=False)
    np.testing.assert_allclose(np.asarray(out["output"][0]),
                               np.asarray(ref["output"][0]),
                               rtol=2e-2, atol=2e-3)
    assert out["output"][0].shape == (N_QUERY, DEC_OUT)
    assert out["volume"][0].shape == (N_QUERY,)
    print("KERNEL_OK")
</pallas_src>

<mosaic_0001>
module attributes {stable_mosaic.version = 11 : i64} {
  func.func @conv3x3_relu_kernel(%arg0: memref<2x9x256xf32, #tpu.memory_space<vmem>>, %arg1: memref<9x16x1xf32, #tpu.memory_space<vmem>>, %arg2: memref<16x1xf32, #tpu.memory_space<vmem>>, %arg3: memref<2x16x256xf32, #tpu.memory_space<vmem>>) attributes {dimension_semantics = [], scalar_prefetch = 0 : i64, scratch_operands = 0 : i64, tpu.core_type = #tpu.core_type<tc>} {
    %c0 = arith.constant 0 : index
    %c0_0 = arith.constant 0 : index
    %c0_1 = arith.constant 0 : index
    %0 = vector.load %arg0[%c0, %c0_0, %c0_1] : memref<2x9x256xf32, #tpu.memory_space<vmem>>, vector<2x9x256xf32>
    %c0_2 = arith.constant 0 : index
    %c0_3 = arith.constant 0 : index
    %c0_4 = arith.constant 0 : index
    %1 = vector.load %arg1[%c0_2, %c0_3, %c0_4] : memref<9x16x1xf32, #tpu.memory_space<vmem>>, vector<9x16x1xf32>
    %cst = arith.constant 0.000000e+00 : f32
    %2 = vector.broadcast %cst : f32 to vector<2x16x256xf32>
    %3 = vector.extract_strided_slice %1 {offsets = [0, 0, 0], sizes = [1, 16, 1], strides = [1, 1, 1]} : vector<9x16x1xf32> to vector<1x16x1xf32>
    %4 = vector.shape_cast %3 : vector<1x16x1xf32> to vector<16x1xf32>
    %5 = vector.shape_cast %4 : vector<16x1xf32> to vector<1x16x1xf32>
    %6 = vector.extract_strided_slice %0 {offsets = [0, 0, 0], sizes = [2, 1, 256], strides = [1, 1, 1]} : vector<2x9x256xf32> to vector<2x1x256xf32>
    %7 = vector.broadcast %5 : vector<1x16x1xf32> to vector<2x16x256xf32>
    %8 = vector.broadcast %6 : vector<2x1x256xf32> to vector<2x16x256xf32>
    %9 = arith.mulf %7, %8 : vector<2x16x256xf32>
    %10 = arith.addf %2, %9 : vector<2x16x256xf32>
    %11 = vector.extract_strided_slice %1 {offsets = [1, 0, 0], sizes = [1, 16, 1], strides = [1, 1, 1]} : vector<9x16x1xf32> to vector<1x16x1xf32>
    %12 = vector.shape_cast %11 : vector<1x16x1xf32> to vector<16x1xf32>
    %13 = vector.shape_cast %12 : vector<16x1xf32> to vector<1x16x1xf32>
    %14 = vector.extract_strided_slice %0 {offsets = [0, 1, 0], sizes = [2, 1, 256], strides = [1, 1, 1]} : vector<2x9x256xf32> to vector<2x1x256xf32>
    %15 = vector.broadcast %13 : vector<1x16x1xf32> to vector<2x16x256xf32>
    %16 = vector.broadcast %14 : vector<2x1x256xf32> to vector<2x16x256xf32>
    %17 = arith.mulf %15, %16 : vector<2x16x256xf32>
    %18 = arith.addf %10, %17 : vector<2x16x256xf32>
    %19 = vector.extract_strided_slice %1 {offsets = [2, 0, 0], sizes = [1, 16, 1], strides = [1, 1, 1]} : vector<9x16x1xf32> to vector<1x16x1xf32>
    %20 = vector.shape_cast %19 : vector<1x16x1xf32> to vector<16x1xf32>
    %21 = vector.shape_cast %20 : vector<16x1xf32> to vector<1x16x1xf32>
    %22 = vector.extract_strided_slice %0 {offsets = [0, 2, 0], sizes = [2, 1, 256], strides = [1, 1, 1]} : vector<2x9x256xf32> to vector<2x1x256xf32>
    %23 = vector.broadcast %21 : vector<1x16x1xf32> to vector<2x16x256xf32>
    %24 = vector.broadcast %22 : vector<2x1x256xf32> to vector<2x16x256xf32>
    %25 = arith.mulf %23, %24 : vector<2x16x256xf32>
    %26 = arith.addf %18, %25 : vector<2x16x256xf32>
    %27 = vector.extract_strided_slice %1 {offsets = [3, 0, 0], sizes = [1, 16, 1], strides = [1, 1, 1]} : vector<9x16x1xf32> to vector<1x16x1xf32>
    %28 = vector.shape_cast %27 : vector<1x16x1xf32> to vector<16x1xf32>
    %29 = vector.shape_cast %28 : vector<16x1xf32> to vector<1x16x1xf32>
    %30 = vector.extract_strided_slice %0 {offsets = [0, 3, 0], sizes = [2, 1, 256], strides = [1, 1, 1]} : vector<2x9x256xf32> to vector<2x1x256xf32>
    %31 = vector.broadcast %29 : vector<1x16x1xf32> to vector<2x16x256xf32>
    %32 = vector.broadcast %30 : vector<2x1x256xf32> to vector<2x16x256xf32>
    %33 = arith.mulf %31, %32 : vector<2x16x256xf32>
    %34 = arith.addf %26, %33 : vector<2x16x256xf32>
    %35 = vector.extract_strided_slice %1 {offsets = [4, 0, 0], sizes = [1, 16, 1], strides = [1, 1, 1]} : vector<9x16x1xf32> to vector<1x16x1xf32>
    %36 = vector.shape_cast %35 : vector<1x16x1xf32> to vector<16x1xf32>
    %37 = vector.shape_cast %36 : vector<16x1xf32> to vector<1x16x1xf32>
    %38 = vector.extract_strided_slice %0 {offsets = [0, 4, 0], sizes = [2, 1, 256], strides = [1, 1, 1]} : vector<2x9x256xf32> to vector<2x1x256xf32>
    %39 = vector.broadcast %37 : vector<1x16x1xf32> to vector<2x16x256xf32>
    %40 = vector.broadcast %38 : vector<2x1x256xf32> to vector<2x16x256xf32>
    %41 = arith.mulf %39, %40 : vector<2x16x256xf32>
    %42 = arith.addf %34, %41 : vector<2x16x256xf32>
    %43 = vector.extract_strided_slice %1 {offsets = [5, 0, 0], sizes = [1, 16, 1], strides = [1, 1, 1]} : vector<9x16x1xf32> to vector<1x16x1xf32>
    %44 = vector.shape_cast %43 : vector<1x16x1xf32> to vector<16x1xf32>
    %45 = vector.shape_cast %44 : vector<16x1xf32> to vector<1x16x1xf32>
    %46 = vector.extract_strided_slice %0 {offsets = [0, 5, 0], sizes = [2, 1, 256], strides = [1, 1, 1]} : vector<2x9x256xf32> to vector<2x1x256xf32>
    %47 = vector.broadcast %45 : vector<1x16x1xf32> to vector<2x16x256xf32>
    %48 = vector.broadcast %46 : vector<2x1x256xf32> to vector<2x16x256xf32>
    %49 = arith.mulf %47, %48 : vector<2x16x256xf32>
    %50 = arith.addf %42, %49 : vector<2x16x256xf32>
    %51 = vector.extract_strided_slice %1 {offsets = [6, 0, 0], sizes = [1, 16, 1], strides = [1, 1, 1]} : vector<9x16x1xf32> to vector<1x16x1xf32>
    %52 = vector.shape_cast %51 : vector<1x16x1xf32> to vector<16x1xf32>
    %53 = vector.shape_cast %52 : vector<16x1xf32> to vector<1x16x1xf32>
    %54 = vector.extract_strided_slice %0 {offsets = [0, 6, 0], sizes = [2, 1, 256], strides = [1, 1, 1]} : vector<2x9x256xf32> to vector<2x1x256xf32>
    %55 = vector.broadcast %53 : vector<1x16x1xf32> to vector<2x16x256xf32>
    %56 = vector.broadcast %54 : vector<2x1x256xf32> to vector<2x16x256xf32>
    %57 = arith.mulf %55, %56 : vector<2x16x256xf32>
    %58 = arith.addf %50, %57 : vector<2x16x256xf32>
    %59 = vector.extract_strided_slice %1 {offsets = [7, 0, 0], sizes = [1, 16, 1], strides = [1, 1, 1]} : vector<9x16x1xf32> to vector<1x16x1xf32>
    %60 = vector.shape_cast %59 : vector<1x16x1xf32> to vector<16x1xf32>
    %61 = vector.shape_cast %60 : vector<16x1xf32> to vector<1x16x1xf32>
    %62 = vector.extract_strided_slice %0 {offsets = [0, 7, 0], sizes = [2, 1, 256], strides = [1, 1, 1]} : vector<2x9x256xf32> to vector<2x1x256xf32>
    %63 = vector.broadcast %61 : vector<1x16x1xf32> to vector<2x16x256xf32>
    %64 = vector.broadcast %62 : vector<2x1x256xf32> to vector<2x16x256xf32>
    %65 = arith.mulf %63, %64 : vector<2x16x256xf32>
    %66 = arith.addf %58, %65 : vector<2x16x256xf32>
    %67 = vector.extract_strided_slice %1 {offsets = [8, 0, 0], sizes = [1, 16, 1], strides = [1, 1, 1]} : vector<9x16x1xf32> to vector<1x16x1xf32>
    %68 = vector.shape_cast %67 : vector<1x16x1xf32> to vector<16x1xf32>
    %69 = vector.shape_cast %68 : vector<16x1xf32> to vector<1x16x1xf32>
    %70 = vector.extract_strided_slice %0 {offsets = [0, 8, 0], sizes = [2, 1, 256], strides = [1, 1, 1]} : vector<2x9x256xf32> to vector<2x1x256xf32>
    %71 = vector.broadcast %69 : vector<1x16x1xf32> to vector<2x16x256xf32>
    %72 = vector.broadcast %70 : vector<2x1x256xf32> to vector<2x16x256xf32>
    %73 = arith.mulf %71, %72 : vector<2x16x256xf32>
    %74 = arith.addf %66, %73 : vector<2x16x256xf32>
    %c0_5 = arith.constant 0 : index
    %c0_6 = arith.constant 0 : index
    %75 = vector.load %arg2[%c0_5, %c0_6] : memref<16x1xf32, #tpu.memory_space<vmem>>, vector<16x1xf32>
    %76 = vector.shape_cast %75 : vector<16x1xf32> to vector<1x16x1xf32>
    %77 = vector.broadcast %76 : vector<1x16x1xf32> to vector<2x16x256xf32>
    %78 = arith.addf %74, %77 : vector<2x16x256xf32>
    %cst_7 = arith.constant 0.000000e+00 : f32
    %79 = vector.broadcast %cst_7 : f32 to vector<2x16x256xf32>
    %80 = arith.maximumf %78, %79 : vector<2x16x256xf32>
    %c0_8 = arith.constant 0 : index
    %c0_9 = arith.constant 0 : index
    %c0_10 = arith.constant 0 : index
    %81 = vector.load %arg3[%c0_8, %c0_9, %c0_10] : memref<2x16x256xf32, #tpu.memory_space<vmem>>, vector<2x16x256xf32>
    tpu.vector_store %arg3[%c0_8, %c0_9, %c0_10], %80 {strides = array<i32>} : memref<2x16x256xf32, #tpu.memory_space<vmem>>, vector<2x16x256xf32>,
    return
  }
}

</mosaic_0001>

<bundles_post_ra>
// kernel: tpu_custom_call.1
= control target key start
LH: loop header
LB: loop body
LE: loop exit
PB: predicated region body
PF: predicated region fallthrough
CT: control target
= control target key end

     0   :  { %v402_v3 = vmov 0   ;;  %s647_s0 = inlined_call_operand.vmem [shape: f32[2,9,256], index: 0, kind: input, shape index: {}]   ;;  %s648_s1 = inlined_call_operand.vmem [shape: f32[9,16,1], index: 1, kind: input, shape index: {}]   ;;  %s649_s2 = inlined_call_operand.vmem [shape: f32[16,1], index: 2, kind: input, shape index: {}]   ;;  %s650_s3 = inlined_call_operand.hbm [shape: f32[2,16,256], index: 3, kind: output, shape index: {}]  }
   0x1   :  { %v27_v0 = vld [vmem:[%s648_s1 + $0x20] sm:$0xff]  ;;  %v25_v1 = vld [vmem:[%s648_s1 + $0x10] sm:$0xff]  ;;  %371 = vset.pattern.permute.xlu2 %v402_v3  ;;  %370 = vset.pattern.permute.xlu1 %v402_v3 }
   0x2   :  { %v23_v2 = vld [vmem:[%s648_s1] sm:$0xff]  ;;  %369 = vset.pattern.permute.xlu0 %v402_v3  ;;  %103 = vperm.xlu2 %371, %v27_v0  }
   0x3   :  { %73 = vperm.xlu1 %370, %v25_v1   ;;  %43 = vperm.xlu0 %369, %v23_v2  }
   0x4   :  { %8 = vsyncpa [#allocation3], 0  ;;  %v28_v4 = vld [vmem:[%s648_s1 + $0x28] sm:$0xff]  ;;  %v26_v5 = vld [vmem:[%s648_s1 + $0x18] sm:$0xff]  ;;  %s353_s15 = sshll.u32 %s650_s3, 4  ;;  %s404_s16 = smov 256   ;;  %s354_s15 = int_to_ptr.hbm [resolvable:$true] %s353_s15 }
   0x5   :  { %v24_v6 = vld [vmem:[%s648_s1 + $0x8] sm:$0xff]  ;;  %v31_v7 = vld [vmem:[%s648_s1 + $0x40] sm:$0xff]  ;;  %v30_v8 = vld [vmem:[%s648_s1 + $0x38] sm:$0xff]  ;;  %s405_s17 = smov 16  }
   0x6   :  { %v29_v9 = vld [vmem:[%s648_s1 + $0x30] sm:$0xff]  ;;  %v34_v10 = vld [vmem:[%s648_s1 + $0x58] sm:$0xff]  ;;  %v32_v12 = vld [vmem:[%s648_s1 + $0x48] sm:$0xff] }
   0x7   :  { %v33_v11 = vld [vmem:[%s648_s1 + $0x50] sm:$0xff]  ;;  %v36_v14 = vld [vmem:[%s648_s1 + $0x68] sm:$0xff]  ;;  %v35_v15 = vld [vmem:[%s648_s1 + $0x60] sm:$0xff] }
   0x8   :  { %v37_v13 = vld [vmem:[%s648_s1 + $0x70] sm:$0xff]  ;;  %v40_v16 = vld [vmem:[%s648_s1 + $0x88] sm:$0xff]  ;;  %v39_v17 = vld [vmem:[%s648_s1 + $0x80] sm:$0xff] }
   0x9   :  { %v38_v18 = vld [vmem:[%s648_s1 + $0x78] sm:$0xff]  ;;  %v312_v19 = vld [vmem:[%s649_s2 + $0x8] sm:$0xff]  ;;  %v311_v20 = vld [vmem:[%s649_s2] sm:$0xff] }
   0xa   :  { %108 = vperm.xlu2 %371, %v28_v4   ;;  %v489_v26 = vld [vmem:[%s647_s0] sm:$0xff]  ;;  %v494_v27 = vld [vmem:[%s647_s0 + $0x8] sm:$0xff] }
   0xb   :  { %78 = vperm.xlu1 %370, %v26_v5   ;;  %48 = vperm.xlu0 %369, %v24_v6   ;;  %v499_v28 = vld [vmem:[%s647_s0 + $0x20] sm:$0xff]  ;;  %v504_v29 = vld [vmem:[%s647_s0 + $0x28] sm:$0xff]  ;;  %v111_v30 = vperm.slane %v489_v26, 2  ;;  %v112_v31 = vperm.slane %v494_v27, 2  ;;  %v171_v34 = vperm.slane %v489_v26, 4  ;;  %v172_v35 = vperm.slane %v494_v27, 4 }
   0xc   :  { %v113_v32 = vperm.slane %v499_v28, 2  ;;  %v114_v33 = vperm.slane %v504_v29, 2  ;;  %v655_v36 = vperm.slane %v499_v28, 4  ;;  %v653_v39 = vperm.slane %v504_v29, 4 }
   0xd   :  { %v651_v40 = vperm.slane %v489_v26, 5  ;;  %v652_v41 = vperm.slane %v494_v27, 5  ;;  %v654_v42 = vperm.slane %v499_v28, 5  ;;  %v204_v43 = vperm.slane %v504_v29, 5 }
   0xe   :  { %v81_v44 = vperm.slane %v489_v26, 1  ;;  %v82_v45 = vperm.slane %v494_v27, 1  ;;  %v83_v46 = vperm.slane %v499_v28, 1  ;;  %v84_v47 = vperm.slane %v504_v29, 1 }
   0xf   :  { %v51_v48 = vperm.slane %v489_v26, 0  ;;  %v52_v49 = vperm.slane %v494_v27, 0  ;;  %v53_v50 = vperm.slane %v499_v28, 0  ;;  %v54_v51 = vperm.slane %v504_v29, 0 }
  0x10   :  { %v656_v52 = vperm.slane %v489_v26, 7  ;;  %v262_v53 = vperm.slane %v494_v27, 7  ;;  %v141_v1 = vperm.slane %v489_v26, 3  ;;  %v142_v2 = vperm.slane %v494_v27, 3 }
  0x11   :  { %v143_v3 = vperm.slane %v499_v28, 3 }
  0x12   :  { %163 = vperm.xlu2 %371, %v31_v7  }
  0x13   :  { %138 = vperm.xlu1 %370, %v30_v8   ;;  %133 = vperm.xlu0 %369, %v29_v9   ;;  %v144_v8 = vperm.slane %v504_v29, 3 }
  0x1a   :  { %198 = vperm.xlu2 %371, %v34_v10  }
  0x1b   :  { %193 = vperm.xlu1 %370, %v33_v11   ;;  %168 = vperm.xlu0 %369, %v32_v12  }
  0x22   :  { %253 = vperm.xlu2 %371, %v37_v13  }
  0x23   :  { %228 = vperm.xlu1 %370, %v36_v14   ;;  %223 = vperm.xlu0 %369, %v35_v15  }
  0x2a   :  { %288 = vperm.xlu2 %371, %v40_v16  }
  0x2b   :  { %283 = vperm.xlu1 %370, %v39_v17   ;;  %258 = vperm.xlu0 %369, %v38_v18  }
  0x33   :  { %320 = vperm.xlu1 %370, %v312_v19   ;;  %315 = vperm.xlu0 %369, %v311_v20  }
  0x5c   :  { %v104_v21 = vpop.permute.xlu2 %103 }
  0x5d   :  { %v115_v55 = vmul.f32 %v111_v30, %v104_v21  ;;  %v116_v56 = vmul.f32 %v112_v31, %v104_v21  ;;  %v119_v57 = vmul.f32 %v113_v32, %v104_v21  ;;  %v120_v60 = vmul.f32 %v114_v33, %v104_v21 }
  0x64   :  { %v109_v22 = vpop.permute.xlu2 %108 }
  0x65   :  { %v117_v61 = vmul.f32 %v111_v30, %v109_v22  ;;  %v118_v62 = vmul.f32 %v112_v31, %v109_v22  ;;  %v530_v63 = vmul.f32 %v113_v32, %v109_v22  ;;  %v532_v0 = vmul.f32 %v114_v33, %v109_v22 }
  0x6c   :  { %v164_v25 = vpop.permute.xlu2 %163 }
  0x6d   :  { %v539_v4 = vmul.f32 %v171_v34, %v164_v25  ;;  %v544_v10 = vmul.f32 %v172_v35, %v164_v25  ;;  %v548_v11 = vmul.f32 %v655_v36, %v164_v25  ;;  %v552_v18 = vmul.f32 %v653_v39, %v164_v25 }
  0x74   :  { %v199_v58 = vpop.permute.xlu2 %198 }
  0x75   :  { %v74_v23 = vpop.permute.xlu1 %73  ;;  %v44_v24 = vpop.permute.xlu0 %43  ;;  %v556_v19 = vmul.f32 %v651_v40, %v199_v58  ;;  %v560_v22 = vmul.f32 %v652_v41, %v199_v58 }
  0x76   :  { %v85_v5 = vmul.f32 %v81_v44, %v74_v23  ;;  %v55_v6 = vmul.f32 %v51_v48, %v44_v24  ;;  %v86_v12 = vmul.f32 %v82_v45, %v74_v23  ;;  %v56_v13 = vmul.f32 %v52_v49, %v44_v24 }
  0x77   :  { %v89_v14 = vmul.f32 %v83_v46, %v74_v23  ;;  %v90_v15 = vmul.f32 %v84_v47, %v74_v23  ;;  %v59_v16 = vmul.f32 %v53_v50, %v44_v24  ;;  %v60_v17 = vmul.f32 %v54_v51, %v44_v24 }
  0x78   :  { %v93_v30 = vadd.f32 %v85_v5, %v55_v6  ;;  %v564_v23 = vmul.f32 %v654_v42, %v199_v58  ;;  %v568_v24 = vmul.f32 %v204_v43, %v199_v58  ;;  %v94_v25 = vadd.f32 %v86_v12, %v56_v13 }
  0x79   :  { %v233_v58 = vperm.slane %v499_v28, 6  ;;  %v234_v12 = vperm.slane %v504_v29, 6 }
  0x7a   :  { %v123_v42 = vadd.f32 %v115_v55, %v93_v30  ;;  %v124_v13 = vadd.f32 %v116_v56, %v94_v25 }
  0x7c   :  { %v254_v41 = vpop.permute.xlu2 %253 }
  0x7d   :  { %v79_v37 = vpop.permute.xlu1 %78  ;;  %v49_v38 = vpop.permute.xlu0 %48 }
  0x7e   :  { %v87_v20 = vmul.f32 %v81_v44, %v79_v37  ;;  %v57_v21 = vmul.f32 %v51_v48, %v49_v38  ;;  %v88_v31 = vmul.f32 %v82_v45, %v79_v37  ;;  %v58_v32 = vmul.f32 %v52_v49, %v49_v38 }
  0x7f   :  { %v97_v44 = vadd.f32 %v89_v14, %v59_v16  ;;  %v98_v48 = vadd.f32 %v90_v15, %v60_v17  ;;  %v91_v40 = vmul.f32 %v83_v46, %v79_v37  ;;  %v61_v59 = vmul.f32 %v53_v50, %v49_v38 }
  0x80   :  { %v92_v39 = vmul.f32 %v84_v47, %v79_v37  ;;  %v62_v5 = vmul.f32 %v54_v51, %v49_v38  ;;  %v95_v45 = vadd.f32 %v87_v20, %v57_v21  ;;  %v232_v49 = vperm.slane %v494_v27, 6 }
  0x81   :  { %v96_v6 = vadd.f32 %v88_v31, %v58_v32  ;;  %v576_v46 = vmul.f32 %v656_v52, %v254_v41  ;;  %v99_v37 = vadd.f32 %v91_v40, %v61_v59  ;;  %v127_v38 = vadd.f32 %v119_v57, %v97_v44 }
  0x82   :  { %v128_v47 = vadd.f32 %v120_v60, %v98_v48  ;;  %v580_v50 = vmul.f32 %v262_v53, %v254_v41  ;;  %v100_v51 = vadd.f32 %v92_v39, %v62_v5  ;;  %v125_v55 = vadd.f32 %v117_v61, %v95_v45 }
  0x83   :  { %v126_v17 = vadd.f32 %v118_v62, %v96_v6  ;;  %v129_v52 = vadd.f32 %v530_v63, %v99_v37  ;;  %v657_v39 = vperm.slane %v499_v28, 4  ;;  %v658_v60 = vperm.slane %v499_v28, 7 }
  0x84   :  { %v130_v62 = vadd.f32 %v532_v0, %v100_v51  ;;  %v660_v63 = vperm.slane %v504_v29, 7  ;;  %v661_v5 = vperm.slane %v489_v26, 5 }
  0x85   :  { %v139_v7 = vpop.permute.xlu1 %138  ;;  %v134_v9 = vpop.permute.xlu0 %133  ;;  %v591_v61 = vmul.f32 %v658_v60, %v254_v41 }
  0x86   :  { %v145_v33 = vmul.f32 %v141_v1, %v134_v9  ;;  %v146_v14 = vmul.f32 %v142_v2, %v134_v9  ;;  %v149_v15 = vmul.f32 %v143_v3, %v134_v9  ;;  %v150_v16 = vmul.f32 %v144_v8, %v134_v9 }
  0x87   :  { %v147_v20 = vmul.f32 %v141_v1, %v139_v7  ;;  %v148_v56 = vmul.f32 %v142_v2, %v139_v7  ;;  %v151_v21 = vmul.f32 %v143_v3, %v139_v7  ;;  %v152_v30 = vmul.f32 %v144_v8, %v139_v7 }
  0x88   :  { %v153_v31 = vadd.f32 %v145_v33, %v123_v42  ;;  %v154_v32 = vadd.f32 %v146_v14, %v124_v13  ;;  %v157_v25 = vadd.f32 %v149_v15, %v127_v38  ;;  %v158_v42 = vadd.f32 %v150_v16, %v128_v47 }
  0x89   :  { %v659_v1 = vperm.slane %v504_v29, 4  ;;  %v598_v3 = vmul.f32 %v660_v63, %v254_v41  ;;  %v156_v7 = vadd.f32 %v148_v56, %v126_v17  ;;  %v160_v33 = vadd.f32 %v152_v30, %v130_v62 }
  0x8a   :  { %v183_v44 = vadd.f32 %v539_v4, %v153_v31  ;;  %v184_v48 = vadd.f32 %v544_v10, %v154_v32  ;;  %v187_v0 = vadd.f32 %v548_v11, %v157_v25  ;;  %v188_v41 = vadd.f32 %v552_v18, %v158_v42 }
  0x8b   :  { %v662_v14 = vperm.slane %v494_v27, 5  ;;  %v663_v15 = vperm.slane %v499_v28, 5  ;;  %v664_v10 = vperm.slane %v489_v26, 6 }
  0x8d   :  { %v194_v54 = vpop.permute.xlu1 %193  ;;  %v169_v36 = vpop.permute.xlu0 %168  ;;  %v665_v16 = vmov %v664_v10 }
  0x8e   :  { %v177_v40 = vmul.f32 %v171_v34, %v169_v36  ;;  %v178_v57 = vmul.f32 %v172_v35, %v169_v36  ;;  %v181_v59 = vmul.f32 %v657_v39, %v169_v36  ;;  %v182_v2 = vmul.f32 %v659_v1, %v169_v36  ;;  %v289_v1 = vpop.permute.xlu2 %288 }
  0x8f   :  { %v155_v34 = vadd.f32 %v147_v20, %v125_v55  ;;  %v159_v35 = vadd.f32 %v151_v21, %v129_v52  ;;  %v205_v45 = vmul.f32 %v661_v5, %v194_v54  ;;  %v206_v52 = vmul.f32 %v662_v14, %v194_v54 }
  0x90   :  { %v186_v6 = vadd.f32 %v178_v57, %v156_v7  ;;  %v209_v37 = vmul.f32 %v663_v15, %v194_v54  ;;  %v190_v38 = vadd.f32 %v182_v2, %v160_v33  ;;  %v210_v4 = vmul.f32 %v204_v43, %v194_v54 }
  0x91   :  { %v185_v36 = vadd.f32 %v177_v40, %v155_v34  ;;  %v189_v13 = vadd.f32 %v181_v59, %v159_v35  ;;  %v213_v56 = vadd.f32 %v205_v45, %v183_v44  ;;  %v214_v32 = vadd.f32 %v206_v52, %v184_v48  ;;  %v372_v40 = vld [vmem:[%s647_s0 + $0x10] ss:$0 sm:$0xff] }
  0x92   :  { %v216_v30 = vadd.f32 %v560_v22, %v186_v6  ;;  %v217_v43 = vadd.f32 %v209_v37, %v187_v0  ;;  %v220_v54 = vadd.f32 %v568_v24, %v190_v38  ;;  %v218_v57 = vadd.f32 %v210_v4, %v188_v41  ;;  %v374_v22 = vld [vmem:[%s647_s0 + $0x30] ss:$0 sm:$0xff] }
  0x93   :  { %v215_v21 = vadd.f32 %v556_v19, %v185_v36  ;;  %v219_v31 = vadd.f32 %v564_v23, %v189_v13  ;;  %v373_v19 = vld [vmem:[%s647_s0 + $0x18] ss:$0 sm:$0xff]  ;;  %v666_v2 = vperm.slane %v489_v26, 7  ;;  %v667_v7 = vperm.slane %v499_v28, 7 }
  0x94   :  { %v375_v23 = vld [vmem:[%s647_s0 + $0x38] ss:$0 sm:$0xff]  ;;  %v297_v13 = vmul.f32 %v372_v40, %v289_v1  ;;  %v298_v26 = vmul.f32 %v373_v19, %v289_v1  ;;  %v301_v41 = vmul.f32 %v374_v22, %v289_v1  ;;  %s403_s0 = smov [#allocation2]  }
  0x95   :  { %v229_v8 = vpop.permute.xlu1 %228  ;;  %v224_v9 = vpop.permute.xlu0 %223  ;;  %v302_v14 = vmul.f32 %v375_v23, %v289_v1  ;;  %s351_s12 = sshll.u32 %s403_s0, 4  ;;  %s352_s12 = int_to_ptr.vmem [resolvable:$true] %s351_s12 }
  0x96   :  { %v237_v11 = vmul.f32 %v664_v10, %v229_v8  ;;  %v238_v47 = vmul.f32 %v232_v49, %v229_v8  ;;  %v241_v51 = vmul.f32 %v233_v58, %v229_v8  ;;  %v242_v55 = vmul.f32 %v234_v12, %v229_v8 }
  0x97   :  { %v235_v17 = vmul.f32 %v665_v16, %v224_v9  ;;  %v236_v18 = vmul.f32 %v232_v49, %v224_v9  ;;  %v239_v20 = vmul.f32 %v233_v58, %v224_v9  ;;  %v240_v25 = vmul.f32 %v234_v12, %v224_v9 }
  0x98   :  { %v245_v39 = vadd.f32 %v237_v11, %v215_v21  ;;  %v246_v49 = vadd.f32 %v238_v47, %v216_v30  ;;  %v249_v58 = vadd.f32 %v241_v51, %v219_v31  ;;  %v250_v24 = vadd.f32 %v242_v55, %v220_v54 }
  0x99   :  { %v243_v12 = vadd.f32 %v235_v17, %v213_v56  ;;  %v244_v62 = vadd.f32 %v236_v18, %v214_v32  ;;  %v247_v42 = vadd.f32 %v239_v20, %v217_v43  ;;  %v668_v8 = vperm.slane %v504_v29, 7 }
  0x9a   :  { %v248_v33 = vadd.f32 %v240_v25, %v218_v57 }
  0x9b   :  { %v274_v28 = vadd.f32 %v580_v50, %v244_v62  ;;  %v277_v29 = vadd.f32 %v591_v61, %v247_v42 }
  0x9c   :  { %v278_v11 = vadd.f32 %v598_v3, %v248_v33 }
  0x9d   :  { %v284_v59 = vpop.permute.xlu1 %283  ;;  %v259_v60 = vpop.permute.xlu0 %258 }
  0x9e   :  { %v267_v63 = vmul.f32 %v666_v2, %v259_v60  ;;  %v268_v34 = vmul.f32 %v262_v53, %v259_v60  ;;  %v271_v35 = vmul.f32 %v667_v7, %v259_v60  ;;  %v272_v9 = vmul.f32 %v668_v8, %v259_v60 }
  0x9f   :  { %v295_v44 = vmul.f32 %v372_v40, %v284_v59  ;;  %v296_v48 = vmul.f32 %v373_v19, %v284_v59  ;;  %v299_v0 = vmul.f32 %v374_v22, %v284_v59  ;;  %v300_v27 = vmul.f32 %v375_v23, %v284_v59 }
  0xa0   :  { %v275_v5 = vadd.f32 %v267_v63, %v245_v39  ;;  %v276_v45 = vadd.f32 %v268_v34, %v246_v49  ;;  %v279_v36 = vadd.f32 %v271_v35, %v249_v58  ;;  %v280_v6 = vadd.f32 %v272_v9, %v250_v24 }
  0xa1   :  { %v273_v53 = vadd.f32 %v576_v46, %v243_v12  ;;  %v304_v51 = vadd.f32 %v296_v48, %v274_v28  ;;  %v307_v55 = vadd.f32 %v299_v0, %v277_v29  ;;  %v308_v46 = vadd.f32 %v300_v27, %v278_v11 }
  0xa2   :  { %v305_v52 = vadd.f32 %v297_v13, %v275_v5  ;;  %v306_v15 = vadd.f32 %v298_v26, %v276_v45  ;;  %v309_v37 = vadd.f32 %v301_v41, %v279_v36  ;;  %v310_v38 = vadd.f32 %v302_v14, %v280_v6 }
  0xa3   :  { %v303_v47 = vadd.f32 %v295_v44, %v273_v53 }
  0xa5   :  { %v321_v4 = vpop.permute.xlu1 %320  ;;  %v316_v10 = vpop.permute.xlu0 %315 }
  0xa6   :  { %v325_v16 = vadd.f32 %v321_v4, %v305_v52  ;;  %v326_v17 = vadd.f32 %v321_v4, %v306_v15  ;;  %v329_v18 = vadd.f32 %v321_v4, %v309_v37  ;;  %v330_v20 = vadd.f32 %v321_v4, %v310_v38 }
  0xa7   :  { %v323_v56 = vadd.f32 %v316_v10, %v303_v47  ;;  %v324_v50 = vadd.f32 %v316_v10, %v304_v51  ;;  %v327_v31 = vadd.f32 %v316_v10, %v307_v55  ;;  %v328_v43 = vadd.f32 %v316_v10, %v308_v46 }
  0xa8   :  { %v333_v21 = vmax.f32 %v325_v16, 0.0  ;;  %v334_v61 = vmax.f32 %v326_v17, 0.0  ;;  %v337_v30 = vmax.f32 %v329_v18, 0.0  ;;  %v338_v32 = vmax.f32 %v330_v20, 0.0 }
  0xa9   :  { %v331_v54 = vmax.f32 %v323_v56, 0.0  ;;  %v332_v3 = vmax.f32 %v324_v50, 0.0  ;;  %v335_v25 = vmax.f32 %v327_v31, 0.0  ;;  %v336_v40 = vmax.f32 %v328_v43, 0.0 }
  0xaa   :  { %341 = vst [vmem:[#allocation2 + $0x10] sm:$0xff] %v333_v21 }
  0xab   :  { %342 = vst [vmem:[#allocation2 + $0x18] sm:$0xff] %v334_v61 }
  0xac   :  { %345 = vst [vmem:[#allocation2 + $0x30] sm:$0xff] %v337_v30 }
  0xad   :  { %346 = vst [vmem:[#allocation2 + $0x38] sm:$0xff] %v338_v32 }
  0xae   :  { %339 = vst [vmem:[#allocation2] sm:$0xff] %v331_v54 }
  0xaf   :  { %340 = vst [vmem:[#allocation2 + $0x8] sm:$0xff] %v332_v3 }
  0xb0   :  { %343 = vst [vmem:[#allocation2 + $0x20] sm:$0xff] %v335_v25 }
  0xb1   :  { %344 = vst [vmem:[#allocation2 + $0x28] sm:$0xff] %v336_v40 }
  0xb2   :  { %359 = dma.vmem_to_hbm [thread:$0]  %s352_s12, 1024, %s354_s15, [#allocation3], %s404_s16, %s404_s16, %s405_s17  }
  0xb3   :  { %400 = dma.done.wait [#allocation3], 1024  }
  0xb4   :  { %401 = vsyncadd [#allocation3], 4294966272 }
  0xb5   :  { %364 = vsyncpa [#allocation3], 1 }

</bundles_post_ra>
